<compile_context>
chip_gen: v6e
topology: v6e:2x2x1
jax: 0.10.0
libtpu: 0.0.40
codegen_flags: <defaults>
</compile_context>

<pallas_src>
import functools

import jax
import jax.numpy as jnp
from jax.experimental import pallas as pl
from jax.experimental.pallas import tpu as pltpu


def _mheadout_kernel(x_ref, w1_ref, b1_ref, w2_ref, b2_ref, o_ref):
    x = x_ref[...].astype(jnp.bfloat16)                              # (TB, D)
    h = jnp.dot(x, w1_ref[...], preferred_element_type=jnp.float32)  # MXU, bf16 in / f32 acc
    h = jnp.maximum(h + b1_ref[...], 0.0)                            # f32 epilogue (TB, H_pad)
    y = jnp.dot(h.astype(jnp.bfloat16), w2_ref[...],
                preferred_element_type=jnp.float32) + b2_ref[...]    # (TB, out_pad)
    o_ref[...] = y.astype(o_ref.dtype)                               # lane-dense store


def _round_up(v, m):
    return ((v + m - 1) // m) * m


def _pick_tile_b(B, tile_b):
    if tile_b is None:
        # >=4 grid steps (2 TCs on v7x x >=2 for pipelining) but keep tiles
        # >=256 rows so the ~0.35us per-step overhead stays amortized.
        tile_b = min(1024, max(256, _round_up(pl.cdiv(B, 4), 8)))
    tb = min(int(tile_b), _round_up(B, 8))
    return max(8, _round_up(tb, 8))


def mheadout_forward(x, packed, out_total, *, tile_b=None, single_buffer_weights=True):
    """Fused MHeadout forward pass.

    x:      (B, input_dim) float32
    packed: dict with
        'w1': (D, H_pad)      bf16, lane-concatenated + zero-padded first-layer weights
        'b1': (1, H_pad)      f32,  concatenated + zero-padded first-layer biases
        'w2': (H_pad, out_pad) bf16, block-diagonal second-layer weights (zero-padded)
        'b2': (1, out_pad)    f32,  concatenated second-layer biases (zero-padded)
    out_total: real (unpadded) sum(output_dims)
    """
    B, D = x.shape
    H_pad = packed["w1"].shape[1]
    out_pad = packed["w2"].shape[1]

    tb = _pick_tile_b(B, tile_b)
    grid = (pl.cdiv(B, tb),)  # ragged last block: OOB reads are row-local, OOB writes dropped

    const = lambda i: (0, 0)  # weights/biases resident in VMEM across grid steps

    def wspec(arr):
        if single_buffer_weights:
            return pl.BlockSpec(arr.shape, const, pipeline_mode=pl.Buffered(1))
        return pl.BlockSpec(arr.shape, const)

    # Explicit VMEM budget: double-buffered x/out tiles + (single-buffered) weights
    # + f32 h intermediate.  Capped at 64 MiB so it also respects v7x per-TC VMEM.
    wbytes = sum(int(packed[k].size) * packed[k].dtype.itemsize for k in ("w1", "b1", "w2", "b2"))
    if not single_buffer_weights:
        wbytes *= 2
    est = (2 * tb * D * x.dtype.itemsize
           + 2 * tb * out_pad * x.dtype.itemsize
           + tb * H_pad * 4
           + wbytes)
    vmem_limit = int(min(64 << 20, max(32 << 20, 2 * est)))

    out = pl.pallas_call(
        _mheadout_kernel,
        out_shape=jax.ShapeDtypeStruct((B, out_pad), x.dtype),
        grid=grid,
        in_specs=[
            pl.BlockSpec((tb, D), lambda i: (i, 0)),
            wspec(packed["w1"]),
            wspec(packed["b1"]),
            wspec(packed["w2"]),
            wspec(packed["b2"]),
        ],
        out_specs=pl.BlockSpec((tb, out_pad), lambda i: (i, 0)),
        compiler_params=pltpu.CompilerParams(
            dimension_semantics=("parallel",),   # shard batch axis across TCs on v7x
            vmem_limit_bytes=vmem_limit),
    )(x, packed["w1"], packed["b1"], packed["w2"], packed["b2"])

    # Columns stay lane-padded inside the kernel for unmasked stores; a consumer
    # that can read the padded slab could skip this slice entirely.
    return out[:, :out_total]


def _uniform_init(key, shape, fan_in):
    # Deterministic init mimicking PyTorch's default Linear init range.
    bound = 1.0 / (fan_in ** 0.5)
    return jax.random.uniform(key, shape, dtype=jnp.float32, minval=-bound, maxval=bound)


def make_params(key, output_dims, input_dim):
    """Per-head parameter list (W1, b1, W2, b2); weights stored as (in, out)."""
    n = len(output_dims)
    keys = jax.random.split(key, 4 * n)
    it = iter(keys)
    heads = []
    for hid in output_dims:
        w1 = _uniform_init(next(it), (input_dim, input_dim), input_dim)
        b1 = _uniform_init(next(it), (1, input_dim), input_dim)
        w2 = _uniform_init(next(it), (input_dim, hid), input_dim)
        b2 = _uniform_init(next(it), (1, hid), input_dim)
        heads.append((w1, b1, w2, b2))
    return heads


def pack_params(heads, input_dim, *, lane=128, param_dtype=jnp.bfloat16):
    """Pack per-head params into the fused, lane-padded, bf16 layout."""
    n = len(heads)
    D = input_dim
    H = n * D
    H_pad = max(lane, _round_up(H, lane))                 # pad hidden concat axis to 128
    out_total = sum(h[2].shape[1] for h in heads)
    out_pad = max(lane, _round_up(out_total, lane))       # pad output axis to 128

    w1 = jnp.zeros((D, H_pad), jnp.float32)
    b1 = jnp.zeros((1, H_pad), jnp.float32)
    w2 = jnp.zeros((H_pad, out_pad), jnp.float32)         # block-diagonal
    b2 = jnp.zeros((1, out_pad), jnp.float32)
    off = 0
    for k, (w1k, b1k, w2k, b2k) in enumerate(heads):
        hid = w2k.shape[1]
        w1 = w1.at[:, k * D:(k + 1) * D].set(w1k)
        b1 = b1.at[:, k * D:(k + 1) * D].set(b1k)
        w2 = w2.at[k * D:(k + 1) * D, off:off + hid].set(w2k)
        b2 = b2.at[:, off:off + hid].set(b2k)
        off += hid

    packed = {"w1": w1.astype(param_dtype), "b1": b1,      # matmul weights in bf16,
              "w2": w2.astype(param_dtype), "b2": b2}      # biases stay f32 (f32 epilogue)
    return packed, out_total


def mheadout_reference(x, heads):
    """Plain-JAX f32 reference of the same forward pass (per-head, like PyTorch)."""
    outs = []
    for (w1, b1, w2, b2) in heads:
        h = jnp.maximum(x @ w1 + b1, 0.0)
        outs.append(h @ w2 + b2)
    return jnp.concatenate(outs, axis=1)


def run_forward(x, packed, out_total, tile_b=None):
    # Prefer single-buffered resident weights (pl.Buffered(1)); fall back to the
    # default double-buffered specs if this JAX build rejects buffer_count=1.
    for sbw in (True, False):
        try:
            fwd = jax.jit(functools.partial(
                mheadout_forward, out_total=out_total, tile_b=tile_b,
                single_buffer_weights=sbw))
            out = fwd(x, packed)
            jax.block_until_ready(out)
            return out
        except Exception:
            if not sbw:
                raise
    raise AssertionError("unreachable")


if __name__ == "__main__":
    # Small shapes consistent with the module: x is 2D (B, input_dim).
    input_dim = 32
    output_dims = (8, 12, 16)       # sum(output_dims) = 36
    B = 8

    key = jax.random.PRNGKey(0)
    k_x, k_p = jax.random.split(key)

    x = jax.random.normal(k_x, (B, input_dim), dtype=jnp.float32)
    heads = make_params(k_p, output_dims, input_dim)
    packed, out_total = pack_params(heads, input_dim)

    out = run_forward(x, packed, out_total)
    ref = mheadout_reference(x, heads)
    assert out.shape == (B, out_total)
    # bf16 matmuls with f32 accumulation -> bf16-appropriate tolerances.
    assert jnp.allclose(out, ref, atol=3e-2, rtol=3e-2)

    # Also exercise the multi-step batch grid / resident-weight path.
    B2 = 256
    x2 = jax.random.normal(jax.random.PRNGKey(1), (B2, input_dim), dtype=jnp.float32)
    out2 = run_forward(x2, packed, out_total, tile_b=128)   # grid of 2 steps
    ref2 = mheadout_reference(x2, heads)
    assert out2.shape == (B2, out_total)
    assert jnp.allclose(out2, ref2, atol=3e-2, rtol=3e-2)

    print("KERNEL_OK")
</pallas_src>

<mosaic_0001>
module attributes {stable_mosaic.version = 11 : i64} {
  func.func @_mheadout_kernel(%arg0: i32, %arg1: memref<8x32xf32, #tpu.memory_space<vmem>>, %arg2: memref<32x128xbf16, #tpu.memory_space<vmem>>, %arg3: memref<1x128xf32, #tpu.memory_space<vmem>>, %arg4: memref<128x128xbf16, #tpu.memory_space<vmem>>, %arg5: memref<1x128xf32, #tpu.memory_space<vmem>>, %arg6: memref<8x128xf32, #tpu.memory_space<vmem>>) attributes {dimension_semantics = [#tpu.dimension_semantics<parallel>], iteration_bounds = array<i64: 1>, scalar_prefetch = 0 : i64, scratch_operands = 0 : i64, tpu.core_type = #tpu.core_type<tc>, window_params = [{transform_indices = @transform_0, window_bounds = array<i64: 8, 32>}, {pipeline_mode = #tpu.pipeline_mode<synchronous>, transform_indices = @transform_1, window_bounds = array<i64: 32, 128>}, {pipeline_mode = #tpu.pipeline_mode<synchronous>, transform_indices = @transform_2, window_bounds = array<i64: 1, 128>}, {pipeline_mode = #tpu.pipeline_mode<synchronous>, transform_indices = @transform_3, window_bounds = array<i64: 128, 128>}, {pipeline_mode = #tpu.pipeline_mode<synchronous>, transform_indices = @transform_4, window_bounds = array<i64: 1, 128>}, {transform_indices = @transform_5, window_bounds = array<i64: 8, 128>}]} {
    %c0 = arith.constant 0 : index
    %c0_0 = arith.constant 0 : index
    %0 = vector.load %arg1[%c0, %c0_0] : memref<8x32xf32, #tpu.memory_space<vmem>>, vector<8x32xf32>
    %1 = arith.truncf %0 : vector<8x32xf32> to vector<8x32xbf16>
    %c0_1 = arith.constant 0 : index
    %c0_2 = arith.constant 0 : index
    %2 = vector.load %arg2[%c0_1, %c0_2] : memref<32x128xbf16, #tpu.memory_space<vmem>>, vector<32x128xbf16>
    %cst = arith.constant dense<0.000000e+00> : vector<8x128xf32>
    %3 = tpu.matmul %1, %2, %cst {dimension_numbers = #tpu.dot_dimension_numbers<[1], [0], [0], [1], [0, 0, 1, 1], [], []>} : vector<8x32xbf16>, vector<32x128xbf16>, vector<8x128xf32> -> vector<8x128xf32>
    %c0_3 = arith.constant 0 : index
    %c0_4 = arith.constant 0 : index
    %4 = vector.load %arg3[%c0_3, %c0_4] : memref<1x128xf32, #tpu.memory_space<vmem>>, vector<1x128xf32>
    %5 = vector.broadcast %4 : vector<1x128xf32> to vector<8x128xf32>
    %6 = arith.addf %3, %5 : vector<8x128xf32>
    %cst_5 = arith.constant 0.000000e+00 : f32
    %7 = vector.broadcast %cst_5 : f32 to vector<8x128xf32>
    %8 = arith.maximumf %6, %7 : vector<8x128xf32>
    %9 = arith.truncf %8 : vector<8x128xf32> to vector<8x128xbf16>
    %c0_6 = arith.constant 0 : index
    %c0_7 = arith.constant 0 : index
    %10 = vector.load %arg4[%c0_6, %c0_7] : memref<128x128xbf16, #tpu.memory_space<vmem>>, vector<128x128xbf16>
    %cst_8 = arith.constant dense<0.000000e+00> : vector<8x128xf32>
    %11 = tpu.matmul %9, %10, %cst_8 {dimension_numbers = #tpu.dot_dimension_numbers<[1], [0], [0], [1], [0, 0, 1, 1], [], []>} : vector<8x128xbf16>, vector<128x128xbf16>, vector<8x128xf32> -> vector<8x128xf32>
    %c0_9 = arith.constant 0 : index
    %c0_10 = arith.constant 0 : index
    %12 = vector.load %arg5[%c0_9, %c0_10] : memref<1x128xf32, #tpu.memory_space<vmem>>, vector<1x128xf32>
    %13 = vector.broadcast %12 : vector<1x128xf32> to vector<8x128xf32>
    %14 = arith.addf %11, %13 : vector<8x128xf32>
    %c0_11 = arith.constant 0 : index
    %c0_12 = arith.constant 0 : index
    %15 = vector.load %arg6[%c0_11, %c0_12] : memref<8x128xf32, #tpu.memory_space<vmem>>, vector<8x128xf32>
    tpu.vector_store %arg6[%c0_11, %c0_12], %14 {strides = array<i32>} : memref<8x128xf32, #tpu.memory_space<vmem>>, vector<8x128xf32>,
    return
  }
  func.func @transform_0(%arg0: i32) -> (i32, i32) {
    %c0_i32 = arith.constant 0 : i32
    %c0_i32_0 = arith.constant 0 : i32
    return %arg0, %c0_i32 : i32, i32
  }
  func.func @transform_1(%arg0: i32) -> (i32, i32) {
    %c0_i32 = arith.constant 0 : i32
    %c0_i32_0 = arith.constant 0 : i32
    %c0_i32_1 = arith.constant 0 : i32
    return %c0_i32, %c0_i32_0 : i32, i32
  }
  func.func @transform_2(%arg0: i32) -> (i32, i32) {
    %c0_i32 = arith.constant 0 : i32
    %c0_i32_0 = arith.constant 0 : i32
    %c0_i32_1 = arith.constant 0 : i32
    return %c0_i32, %c0_i32_0 : i32, i32
  }
  func.func @transform_3(%arg0: i32) -> (i32, i32) {
    %c0_i32 = arith.constant 0 : i32
    %c0_i32_0 = arith.constant 0 : i32
    %c0_i32_1 = arith.constant 0 : i32
    return %c0_i32, %c0_i32_0 : i32, i32
  }
  func.func @transform_4(%arg0: i32) -> (i32, i32) {
    %c0_i32 = arith.constant 0 : i32
    %c0_i32_0 = arith.constant 0 : i32
    %c0_i32_1 = arith.constant 0 : i32
    return %c0_i32, %c0_i32_0 : i32, i32
  }
  func.func @transform_5(%arg0: i32) -> (i32, i32) {
    %c0_i32 = arith.constant 0 : i32
    %c0_i32_0 = arith.constant 0 : i32
    return %arg0, %c0_i32 : i32, i32
  }
}

module attributes {stable_mosaic.version = 11 : i64} {
  func.func @_mheadout_kernel(%arg0: i32, %arg1: memref<8x32xf32, #tpu.memory_space<vmem>>, %arg2: memref<32x128xbf16, #tpu.memory_space<vmem>>, %arg3: memref<1x128xf32, #tpu.memory_space<vmem>>, %arg4: memref<128x128xbf16, #tpu.memory_space<vmem>>, %arg5: memref<1x128xf32, #tpu.memory_space<vmem>>, %arg6: memref<8x128xf32, #tpu.memory_space<vmem>>) attributes {dimension_semantics = [#tpu.dimension_semantics<parallel>], iteration_bounds = array<i64: 1>, scalar_prefetch = 0 : i64, scratch_operands = 0 : i64, tpu.core_type = #tpu.core_type<tc>, window_params = [{transform_indices = @transform_0, window_bounds = array<i64: 8, 32>}, {pipeline_mode = #tpu.pipeline_mode<synchronous>, transform_indices = @transform_1, window_bounds = array<i64: 32, 128>}, {pipeline_mode = #tpu.pipeline_mode<synchronous>, transform_indices = @transform_2, window_bounds = array<i64: 1, 128>}, {pipeline_mode = #tpu.pipeline_mode<synchronous>, transform_indices = @transform_3, window_bounds = array<i64: 128, 128>}, {pipeline_mode = #tpu.pipeline_mode<synchronous>, transform_indices = @transform_4, window_bounds = array<i64: 1, 128>}, {transform_indices = @transform_5, window_bounds = array<i64: 8, 128>}]} {
    %c0 = arith.constant 0 : index
    %c0_0 = arith.constant 0 : index
    %0 = vector.load %arg1[%c0, %c0_0] : memref<8x32xf32, #tpu.memory_space<vmem>>, vector<8x32xf32>
    %1 = arith.truncf %0 : vector<8x32xf32> to vector<8x32xbf16>
    %c0_1 = arith.constant 0 : index
    %c0_2 = arith.constant 0 : index
    %2 = vector.load %arg2[%c0_1, %c0_2] : memref<32x128xbf16, #tpu.memory_space<vmem>>, vector<32x128xbf16>
    %cst = arith.constant dense<0.000000e+00> : vector<8x128xf32>
    %3 = tpu.matmul %1, %2, %cst {dimension_numbers = #tpu.dot_dimension_numbers<[1], [0], [0], [1], [0, 0, 1, 1], [], []>} : vector<8x32xbf16>, vector<32x128xbf16>, vector<8x128xf32> -> vector<8x128xf32>
    %c0_3 = arith.constant 0 : index
    %c0_4 = arith.constant 0 : index
    %4 = vector.load %arg3[%c0_3, %c0_4] : memref<1x128xf32, #tpu.memory_space<vmem>>, vector<1x128xf32>
    %5 = vector.broadcast %4 : vector<1x128xf32> to vector<8x128xf32>
    %6 = arith.addf %3, %5 : vector<8x128xf32>
    %cst_5 = arith.constant 0.000000e+00 : f32
    %7 = vector.broadcast %cst_5 : f32 to vector<8x128xf32>
    %8 = arith.maximumf %6, %7 : vector<8x128xf32>
    %9 = arith.truncf %8 : vector<8x128xf32> to vector<8x128xbf16>
    %c0_6 = arith.constant 0 : index
    %c0_7 = arith.constant 0 : index
    %10 = vector.load %arg4[%c0_6, %c0_7] : memref<128x128xbf16, #tpu.memory_space<vmem>>, vector<128x128xbf16>
    %cst_8 = arith.constant dense<0.000000e+00> : vector<8x128xf32>
    %11 = tpu.matmul %9, %10, %cst_8 {dimension_numbers = #tpu.dot_dimension_numbers<[1], [0], [0], [1], [0, 0, 1, 1], [], []>} : vector<8x128xbf16>, vector<128x128xbf16>, vector<8x128xf32> -> vector<8x128xf32>
    %c0_9 = arith.constant 0 : index
    %c0_10 = arith.constant 0 : index
    %12 = vector.load %arg5[%c0_9, %c0_10] : memref<1x128xf32, #tpu.memory_space<vmem>>, vector<1x128xf32>
    %13 = vector.broadcast %12 : vector<1x128xf32> to vector<8x128xf32>
    %14 = arith.addf %11, %13 : vector<8x128xf32>
    %c0_11 = arith.constant 0 : index
    %c0_12 = arith.constant 0 : index
    %15 = vector.load %arg6[%c0_11, %c0_12] : memref<8x128xf32, #tpu.memory_space<vmem>>, vector<8x128xf32>
    tpu.vector_store %arg6[%c0_11, %c0_12], %14 {strides = array<i32>} : memref<8x128xf32, #tpu.memory_space<vmem>>, vector<8x128xf32>,
    return
  }
  func.func @transform_0(%arg0: i32) -> (i32, i32) {
    %c0_i32 = arith.constant 0 : i32
    %c0_i32_0 = arith.constant 0 : i32
    return %arg0, %c0_i32 : i32, i32
  }
  func.func @transform_1(%arg0: i32) -> (i32, i32) {
    %c0_i32 = arith.constant 0 : i32
    %c0_i32_0 = arith.constant 0 : i32
    %c0_i32_1 = arith.constant 0 : i32
    return %c0_i32, %c0_i32_0 : i32, i32
  }
  func.func @transform_2(%arg0: i32) -> (i32, i32) {
    %c0_i32 = arith.constant 0 : i32
    %c0_i32_0 = arith.constant 0 : i32
    %c0_i32_1 = arith.constant 0 : i32
    return %c0_i32, %c0_i32_0 : i32, i32
  }
  func.func @transform_3(%arg0: i32) -> (i32, i32) {
    %c0_i32 = arith.constant 0 : i32
    %c0_i32_0 = arith.constant 0 : i32
    %c0_i32_1 = arith.constant 0 : i32
    return %c0_i32, %c0_i32_0 : i32, i32
  }
  func.func @transform_4(%arg0: i32) -> (i32, i32) {
    %c0_i32 = arith.constant 0 : i32
    %c0_i32_0 = arith.constant 0 : i32
    %c0_i32_1 = arith.constant 0 : i32
    return %c0_i32, %c0_i32_0 : i32, i32
  }
  func.func @transform_5(%arg0: i32) -> (i32, i32) {
    %c0_i32 = arith.constant 0 : i32
    %c0_i32_0 = arith.constant 0 : i32
    return %arg0, %c0_i32 : i32, i32
  }
}

</mosaic_0001>

<bundles_post_ra>
// kernel: mheadout_forward.1
= control target key start
LH: loop header
LB: loop body
LE: loop exit
PB: predicated region body
PF: predicated region fallthrough
CT: control target
= control target key end

     0   :  { %10 = vsyncpa [#allocation3], 0  ;;  %s473_s0 = inlined_call_operand.hbm [shape: f32[8,32], index: 0, kind: input, shape index: {}]   ;;  %s474_s1 = inlined_call_operand.hbm [shape: bf16[32,128], index: 1, kind: input, shape index: {}]   ;;  %s475_s2 = inlined_call_operand.vmem [shape: f32[1,128], index: 2, kind: input, shape index: {}]   ;;  %s476_s3 = inlined_call_operand.hbm [shape: bf16[128,128], index: 3, kind: input, shape index: {}]   ;;  %s477_s4 = inlined_call_operand.vmem [shape: f32[1,128], index: 4, kind: input, shape index: {}]   ;;  %s478_s5 = inlined_call_operand.hbm [shape: f32[8,128], index: 5, kind: output, shape index: {}]  }
   0x1   :  { %11 = vsyncpa [#allocation6], 0 }
   0x2   :  { %12 = vsyncpa [#allocation4], 0  ;;  %s417_s18 = smov [#allocation5]  }
   0x3   :  { %s28_s19 = sshll.u32 %s417_s18, 4  ;;  %s29_s19 = int_to_ptr.vmem [resolvable:$true] %s28_s19 }
   0x4   :  { %s339_s20 = scalar_lea.vmem %s29_s19, 256  ;;  %p344_p1 = scmp.lt.s32.totalorder %s29_s19, %s29_s19 }
   0x5   :  { %p340_p0 = scmp.ne.s32.totalorder %s29_s19, %s339_s20  ;;  %p345_p2 = scmp.lt.s32.totalorder %s339_s20, %s339_s20 }
   0x7   :  { %p346_p3 = por %p345_p2, %p344_p1 }
   0x9   :  { %p347_p4 = pnand %p346_p3, %p340_p0 }
   0xb   :  { %350 = shalt.err (!%p347_p4)
}
   0xc   :  { %s418_s21 = smov 64   ;;  %s419_s22 = smov 4  }
   0xd   :  { %34 = dma.hbm_to_vmem [thread:$0]  %s474_s1, 256, %s29_s19, [#allocation6], %s418_s21, %s418_s21, %s419_s22  }
   0xe   :  { %s420_s25 = smov [#allocation2]   ;;  %s421_s27 = smov [#allocation7]  }
   0xf   :  { %s19_s26 = sshll.u32 %s420_s25, 4  ;;  %s42_s28 = sshll.u32 %s421_s27, 4  ;;  %s20_s26 = int_to_ptr.vmem [resolvable:$true] %s19_s26  ;;  %s43_s28 = int_to_ptr.vmem [resolvable:$true] %s42_s28 }
  0x10   :  { %s359_s29 = scalar_lea.vmem %s20_s26, 128  ;;  %p364_p6 = scmp.lt.s32.totalorder %s20_s26, %s20_s26 }
  0x11   :  { %p360_p5 = scmp.ne.s32.totalorder %s20_s26, %s359_s29  ;;  %p365_p7 = scmp.lt.s32.totalorder %s359_s29, %s359_s29 }
  0x13   :  { %p366_p8 = por %p365_p7, %p364_p6 }
  0x15   :  { %p367_p9 = pnand %p366_p8, %p360_p5 }
  0x17   :  { %370 = shalt.err (!%p367_p9)
}
  0x18   :  { %22 = dma.hbm_to_vmem [thread:$0]  %s473_s0, 128, %s20_s26, [#allocation3]  }
  0x19   :  { %s379_s7 = scalar_lea.vmem %s43_s28, 1024  ;;  %p384_p11 = scmp.lt.s32.totalorder %s43_s28, %s43_s28 }
  0x1a   :  { %p380_p10 = scmp.ne.s32.totalorder %s43_s28, %s379_s7  ;;  %p385_p12 = scmp.lt.s32.totalorder %s379_s7, %s379_s7 }
  0x1c   :  { %p386_p13 = por %p385_p12, %p384_p11 }
  0x1e   :  { %p387_p0 = pnand %p386_p13, %p380_p10 }
  0x20   :  { %390 = shalt.err (!%p387_p0)
}
  0x21   :  { %48 = dma.hbm_to_vmem [thread:$0]  %s476_s3, 1024, %s43_s28, [#allocation6], %s418_s21, %s418_s21, %s419_s22  }
  0x22   :  { %411 = dma.done.wait [#allocation3], 128  }
  0x23   :  { %412 = vsyncadd [#allocation3], 4294967168 }
  0x24   :  { %413 = dma.done.wait [#allocation6], 1280  }
  0x25   :  { %414 = vsyncadd [#allocation6], 4294966016  ;;  %v422_v0 = vmov 0.0   ;;  %vm423_vm0 = vmmov 0   ;;  %v321_v1 = vld [vmem:[#allocation5 + $0x8] sm:$0xff]   ;;  %v322_v2 = vld [vmem:[#allocation5] sm:$0xff]  }
  0x26   :  { %285 = vmatprep.subr.bf16.mxu0 %v422_v0  ;;  %289 = vmatprep.mubr.msk.bf16.mxu0 %vm423_vm0, %v422_v0  ;;  %v61_v3 = vld [vmem:[#allocation2] sm:$0xff]  ;;  %v323_v4 = vld [vmem:[#allocation7 + $0x38] sm:$0xff]   ;;  %v324_v6 = vld [vmem:[#allocation7 + $0x30] sm:$0xff]   ;;  %vm86_vm1 = vcmask 261120   ;;  %s424_s11 = smov [#allocation8]  }
  0x27   :  { %293 = vmatprep.subr.bf16.mxu1 %v422_v0  ;;  %309 = vmatprep.mubr.msk.bf16.mxu1 %vm423_vm0, %v422_v0  ;;  %v62_v5 = vpack.c.bf16 %v61_v3, %v61_v3  ;;  %v325_v7 = vld [vmem:[#allocation7 + $0x28] sm:$0xff]   ;;  %v326_v8 = vld [vmem:[#allocation7 + $0x20] sm:$0xff]   ;;  %v327_v9 = vld [vmem:[#allocation7 + $0x18] sm:$0xff]   ;;  %s250_s12 = sshll.u32 %s424_s11, 4  ;;  %s251_s12 = int_to_ptr.vmem [resolvable:$true] %s250_s12 }
  0x28   :  { %286 = vmatpush3.bf16.msra.mxu0 %v321_v1  ;;  %294 = vmatpush3.bf16.msra.mxu1 %v323_v4  ;;  %v328_v10 = vld [vmem:[#allocation7 + $0x10] sm:$0xff]   ;;  %v329_v11 = vld [vmem:[#allocation7 + $0x8] sm:$0xff]   ;;  %v330_v12 = vld [vmem:[#allocation7] sm:$0xff]   ;;  %p396_p2 = scmp.lt.s32.totalorder %s251_s12, %s251_s12 }
  0x29   :  { %287 = vmatprep.subr.bf16.mxu0 %v422_v0  ;;  %295 = vmatprep.subr.bf16.mxu1 %v422_v0  ;;  %v260_v13 = vld [vmem:[%s475_s2] ss:$0 sm:$0xff]  ;;  %s391_s2 = scalar_lea.vmem %s251_s12, 128 }
  0x2a   :  { %v264_v21 = vld [vmem:[%s477_s4] ss:$0 sm:$0xff]  ;;  %p392_p1 = scmp.ne.s32.totalorder %s251_s12, %s391_s2  ;;  %p397_p3 = scmp.lt.s32.totalorder %s391_s2, %s391_s2 }
  0x2c   :  { %288 = vmatpush3.bf16.msra.mxu0 %v322_v2  ;;  %296 = vmatpush3.bf16.msra.mxu1 %v324_v6  ;;  %p398_p4 = por %p397_p3, %p396_p2 }
  0x2d   :  { %297 = vmatprep.subr.bf16.mxu1 %v422_v0 }
  0x2e   :  { %p399_p5 = pnand %p398_p4, %p392_p1 }
  0x2f   :  { %290 = vmatmul.mubr.msk.bf16.vlgmr.msra.gmra.mxu0 %vm86_vm1, %v62_v5 }
  0x30   :  { %298 = vmatpush3.bf16.msra.mxu1 %v325_v7 }
  0x31   :  { %299 = vmatprep.subr.bf16.mxu1 %v422_v0 }
  0x34   :  { %300 = vmatpush3.bf16.msra.mxu1 %v326_v8 }
  0x35   :  { %301 = vmatprep.subr.bf16.mxu1 %v422_v0 }
  0x38   :  { %302 = vmatpush3.bf16.msra.mxu1 %v327_v9 }
  0x39   :  { %303 = vmatprep.subr.bf16.mxu1 %v422_v0 }
  0x3c   :  { %304 = vmatpush3.bf16.msra.mxu1 %v328_v10 }
  0x3d   :  { %305 = vmatprep.subr.bf16.mxu1 %v422_v0 }
  0x40   :  { %306 = vmatpush3.bf16.msra.mxu1 %v329_v11 }
  0x41   :  { %307 = vmatprep.subr.bf16.mxu1 %v422_v0 }
  0x44   :  { %308 = vmatpush3.bf16.msra.mxu1 %v330_v12 }
  0xef   :  { %v124_v14 = vpop.f32.mrf.mxu0 }
  0xf0   :  { %v125_v15 = vadd.f32 %v260_v13, %v124_v14 }
  0xf1   :  { %v291_v16 = vpop.f32.mrf.mxu0 }
  0xf2   :  { %v130_v17 = vmax.f32 %v125_v15, 0.0 }
  0xf3   :  { %v127_v18 = vpop.f32.mrf.mxu0 }
  0xf4   :  { %v131_v19 = vpack.c.bf16 %v130_v17, %v130_v17 }
  0xf5   :  { %v292_v20 = vpop.f32.mrf.mxu0 }
  0xf6   :  { %310 = vmatmul.mubr.bf16.vlgmr.msra.gmra.mxu1 %v131_v19 }
 0x1b6   :  { %v237_v22 = vpop.f32.mrf.mxu1 }
 0x1b7   :  { %v238_v23 = vadd.f32 %v264_v21, %v237_v22 }
 0x1b8   :  { %v311_v24 = vpop.f32.mrf.mxu1 }
 0x1b9   :  { %243 = vst [vmem:[#allocation8] sm:$0xff] %v238_v23 }
 0x1ba   :  { %v240_v25 = vpop.f32.mrf.mxu1 }
 0x1bb   :  { %402 = shalt.err (!%p399_p5)
}
 0x1bc   :  { %253 = dma.vmem_to_hbm [thread:$0]  %s251_s12, 128, %s478_s5, [#allocation4]   ;;  %v312_v26 = vpop.f32.mrf.mxu1 }
 0x1bd   :  { %415 = dma.done.wait [#allocation4], 128  }
 0x1be   :  { %416 = vsyncadd [#allocation4], 4294967168 }
 0x1bf   :  { %257 = vsyncpa [#allocation3], 1 }
 0x1c0   :  { %258 = vsyncpa [#allocation6], 1 }
 0x1c1   :  { %259 = vsyncpa [#allocation4], 1 }

// kernel: mheadout_forward.1
= control target key start
LH: loop header
LB: loop body
LE: loop exit
PB: predicated region body
PF: predicated region fallthrough
CT: control target
= control target key end

     0   :  { %10 = vsyncpa [#allocation3], 0  ;;  %s473_s0 = inlined_call_operand.hbm [shape: f32[8,32], index: 0, kind: input, shape index: {}]   ;;  %s474_s1 = inlined_call_operand.hbm [shape: bf16[32,128], index: 1, kind: input, shape index: {}]   ;;  %s475_s2 = inlined_call_operand.vmem [shape: f32[1,128], index: 2, kind: input, shape index: {}]   ;;  %s476_s3 = inlined_call_operand.hbm [shape: bf16[128,128], index: 3, kind: input, shape index: {}]   ;;  %s477_s4 = inlined_call_operand.vmem [shape: f32[1,128], index: 4, kind: input, shape index: {}]   ;;  %s478_s5 = inlined_call_operand.hbm [shape: f32[8,128], index: 5, kind: output, shape index: {}]  }
   0x1   :  { %11 = vsyncpa [#allocation6], 0 }
   0x2   :  { %12 = vsyncpa [#allocation4], 0  ;;  %s417_s18 = smov [#allocation5]  }
   0x3   :  { %s28_s19 = sshll.u32 %s417_s18, 4  ;;  %s29_s19 = int_to_ptr.vmem [resolvable:$true] %s28_s19 }
   0x4   :  { %s339_s20 = scalar_lea.vmem %s29_s19, 256  ;;  %p344_p1 = scmp.lt.s32.totalorder %s29_s19, %s29_s19 }
   0x5   :  { %p340_p0 = scmp.ne.s32.totalorder %s29_s19, %s339_s20  ;;  %p345_p2 = scmp.lt.s32.totalorder %s339_s20, %s339_s20 }
   0x7   :  { %p346_p3 = por %p345_p2, %p344_p1 }
   0x9   :  { %p347_p4 = pnand %p346_p3, %p340_p0 }
   0xb   :  { %350 = shalt.err (!%p347_p4)
}
   0xc   :  { %s418_s21 = smov 64   ;;  %s419_s22 = smov 4  }
   0xd   :  { %34 = dma.hbm_to_vmem [thread:$0]  %s474_s1, 256, %s29_s19, [#allocation6], %s418_s21, %s418_s21, %s419_s22  }
   0xe   :  { %s420_s25 = smov [#allocation2]   ;;  %s421_s27 = smov [#allocation7]  }
   0xf   :  { %s19_s26 = sshll.u32 %s420_s25, 4  ;;  %s42_s28 = sshll.u32 %s421_s27, 4  ;;  %s20_s26 = int_to_ptr.vmem [resolvable:$true] %s19_s26  ;;  %s43_s28 = int_to_ptr.vmem [resolvable:$true] %s42_s28 }
  0x10   :  { %s359_s29 = scalar_lea.vmem %s20_s26, 128  ;;  %p364_p6 = scmp.lt.s32.totalorder %s20_s26, %s20_s26 }
  0x11   :  { %p360_p5 = scmp.ne.s32.totalorder %s20_s26, %s359_s29  ;;  %p365_p7 = scmp.lt.s32.totalorder %s359_s29, %s359_s29 }
  0x13   :  { %p366_p8 = por %p365_p7, %p364_p6 }
  0x15   :  { %p367_p9 = pnand %p366_p8, %p360_p5 }
  0x17   :  { %370 = shalt.err (!%p367_p9)
}
  0x18   :  { %22 = dma.hbm_to_vmem [thread:$0]  %s473_s0, 128, %s20_s26, [#allocation3]  }
  0x19   :  { %s379_s7 = scalar_lea.vmem %s43_s28, 1024  ;;  %p384_p11 = scmp.lt.s32.totalorder %s43_s28, %s43_s28 }
  0x1a   :  { %p380_p10 = scmp.ne.s32.totalorder %s43_s28, %s379_s7  ;;  %p385_p12 = scmp.lt.s32.totalorder %s379_s7, %s379_s7 }
  0x1c   :  { %p386_p13 = por %p385_p12, %p384_p11 }
  0x1e   :  { %p387_p0 = pnand %p386_p13, %p380_p10 }
  0x20   :  { %390 = shalt.err (!%p387_p0)
}
  0x21   :  { %48 = dma.hbm_to_vmem [thread:$0]  %s476_s3, 1024, %s43_s28, [#allocation6], %s418_s21, %s418_s21, %s419_s22  }
  0x22   :  { %411 = dma.done.wait [#allocation3], 128  }
  0x23   :  { %412 = vsyncadd [#allocation3], 4294967168 }
  0x24   :  { %413 = dma.done.wait [#allocation6], 1280  }
  0x25   :  { %414 = vsyncadd [#allocation6], 4294966016  ;;  %v422_v0 = vmov 0.0   ;;  %vm423_vm0 = vmmov 0   ;;  %v321_v1 = vld [vmem:[#allocation5 + $0x8] sm:$0xff]   ;;  %v322_v2 = vld [vmem:[#allocation5] sm:$0xff]  }
  0x26   :  { %285 = vmatprep.subr.bf16.mxu0 %v422_v0  ;;  %289 = vmatprep.mubr.msk.bf16.mxu0 %vm423_vm0, %v422_v0  ;;  %v61_v3 = vld [vmem:[#allocation2] sm:$0xff]  ;;  %v323_v4 = vld [vmem:[#allocation7 + $0x38] sm:$0xff]   ;;  %v324_v6 = vld [vmem:[#allocation7 + $0x30] sm:$0xff]   ;;  %vm86_vm1 = vcmask 261120   ;;  %s424_s11 = smov [#allocation8]  }
  0x27   :  { %293 = vmatprep.subr.bf16.mxu1 %v422_v0  ;;  %309 = vmatprep.mubr.msk.bf16.mxu1 %vm423_vm0, %v422_v0  ;;  %v62_v5 = vpack.c.bf16 %v61_v3, %v61_v3  ;;  %v325_v7 = vld [vmem:[#allocation7 + $0x28] sm:$0xff]   ;;  %v326_v8 = vld [vmem:[#allocation7 + $0x20] sm:$0xff]   ;;  %v327_v9 = vld [vmem:[#allocation7 + $0x18] sm:$0xff]   ;;  %s250_s12 = sshll.u32 %s424_s11, 4  ;;  %s251_s12 = int_to_ptr.vmem [resolvable:$true] %s250_s12 }
  0x28   :  { %286 = vmatpush3.bf16.msra.mxu0 %v321_v1  ;;  %294 = vmatpush3.bf16.msra.mxu1 %v323_v4  ;;  %v328_v10 = vld [vmem:[#allocation7 + $0x10] sm:$0xff]   ;;  %v329_v11 = vld [vmem:[#allocation7 + $0x8] sm:$0xff]   ;;  %v330_v12 = vld [vmem:[#allocation7] sm:$0xff]   ;;  %p396_p2 = scmp.lt.s32.totalorder %s251_s12, %s251_s12 }
  0x29   :  { %287 = vmatprep.subr.bf16.mxu0 %v422_v0  ;;  %295 = vmatprep.subr.bf16.mxu1 %v422_v0  ;;  %v260_v13 = vld [vmem:[%s475_s2] ss:$0 sm:$0xff]  ;;  %s391_s2 = scalar_lea.vmem %s251_s12, 128 }
  0x2a   :  { %v264_v21 = vld [vmem:[%s477_s4] ss:$0 sm:$0xff]  ;;  %p392_p1 = scmp.ne.s32.totalorder %s251_s12, %s391_s2  ;;  %p397_p3 = scmp.lt.s32.totalorder %s391_s2, %s391_s2 }
  0x2c   :  { %288 = vmatpush3.bf16.msra.mxu0 %v322_v2  ;;  %296 = vmatpush3.bf16.msra.mxu1 %v324_v6  ;;  %p398_p4 = por %p397_p3, %p396_p2 }
  0x2d   :  { %297 = vmatprep.subr.bf16.mxu1 %v422_v0 }
  0x2e   :  { %p399_p5 = pnand %p398_p4, %p392_p1 }
  0x2f   :  { %290 = vmatmul.mubr.msk.bf16.vlgmr.msra.gmra.mxu0 %vm86_vm1, %v62_v5 }
  0x30   :  { %298 = vmatpush3.bf16.msra.mxu1 %v325_v7 }
  0x31   :  { %299 = vmatprep.subr.bf16.mxu1 %v422_v0 }
  0x34   :  { %300 = vmatpush3.bf16.msra.mxu1 %v326_v8 }
  0x35   :  { %301 = vmatprep.subr.bf16.mxu1 %v422_v0 }
  0x38   :  { %302 = vmatpush3.bf16.msra.mxu1 %v327_v9 }
  0x39   :  { %303 = vmatprep.subr.bf16.mxu1 %v422_v0 }
  0x3c   :  { %304 = vmatpush3.bf16.msra.mxu1 %v328_v10 }
  0x3d   :  { %305 = vmatprep.subr.bf16.mxu1 %v422_v0 }
  0x40   :  { %306 = vmatpush3.bf16.msra.mxu1 %v329_v11 }
  0x41   :  { %307 = vmatprep.subr.bf16.mxu1 %v422_v0 }
  0x44   :  { %308 = vmatpush3.bf16.msra.mxu1 %v330_v12 }
  0xef   :  { %v124_v14 = vpop.f32.mrf.mxu0 }
  0xf0   :  { %v125_v15 = vadd.f32 %v260_v13, %v124_v14 }
  0xf1   :  { %v291_v16 = vpop.f32.mrf.mxu0 }
  0xf2   :  { %v130_v17 = vmax.f32 %v125_v15, 0.0 }
  0xf3   :  { %v127_v18 = vpop.f32.mrf.mxu0 }
  0xf4   :  { %v131_v19 = vpack.c.bf16 %v130_v17, %v130_v17 }
  0xf5   :  { %v292_v20 = vpop.f32.mrf.mxu0 }
  0xf6   :  { %310 = vmatmul.mubr.bf16.vlgmr.msra.gmra.mxu1 %v131_v19 }
 0x1b6   :  { %v237_v22 = vpop.f32.mrf.mxu1 }
 0x1b7   :  { %v238_v23 = vadd.f32 %v264_v21, %v237_v22 }
 0x1b8   :  { %v311_v24 = vpop.f32.mrf.mxu1 }
 0x1b9   :  { %243 = vst [vmem:[#allocation8] sm:$0xff] %v238_v23 }
 0x1ba   :  { %v240_v25 = vpop.f32.mrf.mxu1 }
 0x1bb   :  { %402 = shalt.err (!%p399_p5)
}
 0x1bc   :  { %253 = dma.vmem_to_hbm [thread:$0]  %s251_s12, 128, %s478_s5, [#allocation4]   ;;  %v312_v26 = vpop.f32.mrf.mxu1 }
 0x1bd   :  { %415 = dma.done.wait [#allocation4], 128  }
 0x1be   :  { %416 = vsyncadd [#allocation4], 4294967168 }
 0x1bf   :  { %257 = vsyncpa [#allocation3], 1 }
 0x1c0   :  { %258 = vsyncpa [#allocation6], 1 }
 0x1c1   :  { %259 = vsyncpa [#allocation4], 1 }

</bundles_post_ra>
